<compile_context>
chip_gen: v7x
topology: tpu7x:2x2x1
jax: 0.10.0
libtpu: 0.0.40
codegen_flags: <defaults>
</compile_context>

<pallas_src>
import functools

import jax
import jax.numpy as jnp
from jax.experimental import pallas as pl
from jax.experimental.pallas import tpu as pltpu


LANE = 128        # vreg lane width: pack-buffer segments are lane-aligned
SUBLANE = 8       # vreg sublane width: batch tiles are multiples of this
MAX_TILE_B = 512  # batch-tile cap; sweep 256..1024 on v5e/v6e (128 MiB VMEM),
                  # keep <=512 on v7x (64 MiB). VMEM use here is tiny, so the
                  # cap mainly amortizes the ~0.35us/step pipeline overhead.


def _cdiv(a, b):
    return -(-a // b)


def _round_up(x, m):
    return _cdiv(x, m) * m


@functools.lru_cache(maxsize=None)
def _vmem_limit_bytes():
    """Generation-aware scoped-VMEM limit: 3/4 of the physical per-core VMEM."""
    try:
        cap = int(pltpu.get_tpu_info().vmem_capacity_bytes)
        return (3 * cap) // 4
    except Exception:
        return None  # fall back to the compiler's default scoped limit


def _meta_modality_kernel(m1_ref, m2_ref, w_ref, b_ref, out_ref, x_ref):
    """out = [m1 | m2] @ Weff + beff  -- one MXU matmul per batch tile."""
    d1 = m1_ref.shape[1]
    d2 = m2_ref.shape[1]
    k1 = _round_up(d1, LANE)          # lane-aligned start of the m2 segment
    cd = x_ref.dtype

    # Zero the pack buffer so the (zero-weighted) pad columns can never inject
    # stale NaN/Inf from a previous kernel; a handful of vreg-wide VMEM stores.
    x_ref[...] = jnp.zeros_like(x_ref)
    # In-kernel activation cast (f32 -> compute dtype): no separate XLA cast
    # pass over HBM, the cast rides the VPU while the tile sits in VMEM.
    x_ref[:, :d1] = m1_ref[...].astype(cd)
    x_ref[:, k1:k1 + d2] = m2_ref[...].astype(cd)

    # Single fused matmul (fc1 + fc2 + output_layer), f32 accumulation on MXU.
    acc = jnp.dot(x_ref[...], w_ref[...], preferred_element_type=jnp.float32)
    out_ref[...] = (acc + b_ref[...]).astype(out_ref.dtype)


def fold_params(params, compute_dtype=jnp.bfloat16):
    """One-time algebraic collapse of fc1/fc2/output_layer (PyTorch layout).

    params: w1 (H, D1), b1 (H,), w2 (H, D2), b2 (H,), wo (O, 2H), bo (O,).
    Returns a stacked effective weight whose row layout matches the kernel's
    lane-aligned pack buffer:
        rows [0, D1)               = Weff1
        rows [D1, roundup(D1,128)) = 0
        rows [roundup(D1,128), ..) = Weff2
    """
    H = params["w1"].shape[0]
    O = params["wo"].shape[0]
    d1 = params["w1"].shape[1]
    d2 = params["w2"].shape[1]

    wo1 = params["wo"][:, :H]                # (O, H)
    wo2 = params["wo"][:, H:]                # (O, H)
    weff1 = params["w1"].T @ wo1.T           # (D1, O)
    weff2 = params["w2"].T @ wo2.T           # (D2, O)
    beff = params["b1"] @ wo1.T + params["b2"] @ wo2.T + params["bo"]   # (O,)

    k1 = _round_up(d1, LANE)
    weff = jnp.zeros((k1 + d2, O), jnp.float32)
    weff = weff.at[:d1, :].set(weff1)
    weff = weff.at[k1:, :].set(weff2)

    # TODO(synk): on v7x with a relaxed accuracy budget, store weff in fp8
    # (e4m3) here and feed the MXU's fp8 mode (not applicable on v5e/v6e).
    return {
        "weff": weff.astype(compute_dtype),              # (K_pad, O)
        "beff": beff.reshape(1, O).astype(jnp.float32),  # (1, O), f32 bias
    }


@functools.partial(jax.jit, static_argnames=("tile_b", "out_dtype"))
def meta_modality_hybrid(modality1, modality2, folded, *, tile_b=MAX_TILE_B,
                         out_dtype=None):
    """Pallas forward of MetaModalityHybrid: out = [m1 | m2] @ Weff + beff."""
    B, d1 = modality1.shape
    b_chk, d2 = modality2.shape
    k_pad, O = folded["weff"].shape
    assert b_chk == B, "modality batch sizes differ"
    assert k_pad == _round_up(d1, LANE) + d2, "folded weights don't match inputs"
    compute_dtype = folded["weff"].dtype
    if out_dtype is None:
        out_dtype = modality1.dtype   # pass bf16 here if downstream allows it

    # Balanced batch tiles; >= 2 grid steps whenever possible so v7x's two
    # TensorCores both get a share of the "parallel" batch axis (the extra
    # step is free on single-core v5e/v6e and lets the next tile's input DMA
    # overlap the current tile's compute).
    min_steps = 2 if B >= 2 * SUBLANE else 1
    num_tiles = max(_cdiv(B, tile_b), min_steps)
    tb = _round_up(_cdiv(B, num_tiles), SUBLANE)
    num_tiles = _cdiv(B, tb)          # Pallas clips the partial last block

    cp_kwargs = dict(dimension_semantics=("parallel",))
    vmem_limit = _vmem_limit_bytes()
    if vmem_limit is not None:
        cp_kwargs["vmem_limit_bytes"] = vmem_limit

    grid_spec = pltpu.PrefetchScalarGridSpec(
        num_scalar_prefetch=0,
        grid=(num_tiles,),
        in_specs=[
            # Activations: streamed / double-buffered over the batch grid.
            pl.BlockSpec((tb, d1), lambda i: (i, 0)),
            pl.BlockSpec((tb, d2), lambda i: (i, 0)),
            # Folded weights + bias: VMEM-resident (constant block index).
            # TODO(synk): on v7x add pipeline_mode=pl.Buffered(1) to these two
            # specs to drop the redundant second buffer once the panels grow.
            pl.BlockSpec((k_pad, O), lambda i: (0, 0)),
            pl.BlockSpec((1, O), lambda i: (0, 0)),
        ],
        # Unpadded, direct (B, O) output: no inflated lane padding and no
        # post-kernel slice pass.
        out_specs=pl.BlockSpec((tb, O), lambda i: (i, 0)),
        scratch_shapes=[pltpu.VMEM((tb, k_pad), compute_dtype)],
    )

    # TODO(synk): if D1/D2 * O ever outgrow VMEM, add a second "parallel" grid
    # axis tiling O (stream weight panels) before resorting to a K-reduction axis.
    return pl.pallas_call(
        _meta_modality_kernel,
        out_shape=jax.ShapeDtypeStruct((B, O), out_dtype),
        grid_spec=grid_spec,
        compiler_params=pltpu.CompilerParams(**cp_kwargs),
    )(modality1, modality2, folded["weff"], folded["beff"])


def init_params(key, input_dim1, input_dim2, hidden_dim, output_dim):
    """Deterministic init mimicking nn.Linear default U(-1/sqrt(fan_in), +)."""
    ks = jax.random.split(key, 6)

    def lin(kw, kb, fan_in, fan_out):
        bound = 1.0 / jnp.sqrt(fan_in)
        w = jax.random.uniform(kw, (fan_out, fan_in), jnp.float32, -bound, bound)
        b = jax.random.uniform(kb, (fan_out,), jnp.float32, -bound, bound)
        return w, b

    w1, b1 = lin(ks[0], ks[1], input_dim1, hidden_dim)
    w2, b2 = lin(ks[2], ks[3], input_dim2, hidden_dim)
    wo, bo = lin(ks[4], ks[5], hidden_dim * 2, output_dim)
    return {"w1": w1, "b1": b1, "w2": w2, "b2": b2, "wo": wo, "bo": bo}


def reference(modality1, modality2, p):
    x1 = modality1 @ p["w1"].T + p["b1"]
    x2 = modality2 @ p["w2"].T + p["b2"]
    combined = jnp.concatenate([x1, x2], axis=1)
    return combined @ p["wo"].T + p["bo"]


if __name__ == "__main__":
    B, D1, D2, H, O = 8, 16, 32, 32, 16

    key = jax.random.PRNGKey(0)
    k1, k2, kp = jax.random.split(key, 3)
    modality1 = jax.random.normal(k1, (B, D1), jnp.float32)
    modality2 = jax.random.normal(k2, (B, D2), jnp.float32)
    params = init_params(kp, D1, D2, H, O)

    # One-time weight folding (hoisted out of the forward path).
    folded = fold_params(params)
    folded = jax.tree_util.tree_map(jax.block_until_ready, folded)

    out = meta_modality_hybrid(modality1, modality2, folded)
    out = jax.block_until_ready(out)

    ref = reference(modality1, modality2, params)
    assert out.shape == (B, O), f"bad shape {out.shape}"
    # bf16 folded weights + bf16 activations (f32 accumulation) vs f32 reference.
    assert jnp.allclose(out, ref, atol=2e-2, rtol=2e-2), "mismatch vs reference"
    print("KERNEL_OK")
</pallas_src>

<mosaic_0001>
module attributes {stable_mosaic.version = 11 : i64} {
  func.func @_meta_modality_kernel(%arg0: i32, %arg1: memref<8x16xf32, #tpu.memory_space<vmem>>, %arg2: memref<8x32xf32, #tpu.memory_space<vmem>>, %arg3: memref<160x16xbf16, #tpu.memory_space<vmem>>, %arg4: memref<1x16xf32, #tpu.memory_space<vmem>>, %arg5: memref<8x16xf32, #tpu.memory_space<vmem>>, %arg6: memref<8x160xbf16, #tpu.memory_space<vmem>>) attributes {dimension_semantics = [#tpu.dimension_semantics<parallel>], iteration_bounds = array<i64: 1>, scalar_prefetch = 0 : i64, scratch_operands = 1 : i64, tpu.core_type = #tpu.core_type<tc>, window_params = [{transform_indices = @transform_0, window_bounds = array<i64: 8, 16>}, {transform_indices = @transform_1, window_bounds = array<i64: 8, 32>}, {pipeline_mode = #tpu.pipeline_mode<synchronous>, transform_indices = @transform_2, window_bounds = array<i64: 160, 16>}, {pipeline_mode = #tpu.pipeline_mode<synchronous>, transform_indices = @transform_3, window_bounds = array<i64: 1, 16>}, {transform_indices = @transform_4, window_bounds = array<i64: 8, 16>}]} {
    %cst = arith.constant 0.000000e+00 : bf16
    %0 = vector.broadcast %cst : bf16 to vector<8x160xbf16>
    %c0 = arith.constant 0 : index
    %c0_0 = arith.constant 0 : index
    %1 = vector.load %arg6[%c0, %c0_0] : memref<8x160xbf16, #tpu.memory_space<vmem>>, vector<8x160xbf16>
    tpu.vector_store %arg6[%c0, %c0_0], %0 {strides = array<i32>} : memref<8x160xbf16, #tpu.memory_space<vmem>>, vector<8x160xbf16>,
    %c0_1 = arith.constant 0 : index
    %c0_2 = arith.constant 0 : index
    %2 = vector.load %arg1[%c0_1, %c0_2] : memref<8x16xf32, #tpu.memory_space<vmem>>, vector<8x16xf32>
    %3 = arith.truncf %2 : vector<8x16xf32> to vector<8x16xbf16>
    %c0_3 = arith.constant 0 : index
    %c0_4 = arith.constant 0 : index
    %4 = vector.load %arg6[%c0_3, %c0_4] : memref<8x160xbf16, #tpu.memory_space<vmem>>, vector<8x16xbf16>
    tpu.vector_store %arg6[%c0_3, %c0_4], %3 {strides = array<i32>} : memref<8x160xbf16, #tpu.memory_space<vmem>>, vector<8x16xbf16>,
    %c0_5 = arith.constant 0 : index
    %c0_6 = arith.constant 0 : index
    %5 = vector.load %arg2[%c0_5, %c0_6] : memref<8x32xf32, #tpu.memory_space<vmem>>, vector<8x32xf32>
    %6 = arith.truncf %5 : vector<8x32xf32> to vector<8x32xbf16>
    %c0_7 = arith.constant 0 : index
    %c128 = arith.constant 128 : index
    %7 = vector.load %arg6[%c0_7, %c128] : memref<8x160xbf16, #tpu.memory_space<vmem>>, vector<8x32xbf16>
    tpu.vector_store %arg6[%c0_7, %c128], %6 {strides = array<i32>} : memref<8x160xbf16, #tpu.memory_space<vmem>>, vector<8x32xbf16>,
    %c0_8 = arith.constant 0 : index
    %c0_9 = arith.constant 0 : index
    %8 = vector.load %arg6[%c0_8, %c0_9] : memref<8x160xbf16, #tpu.memory_space<vmem>>, vector<8x160xbf16>
    %c0_10 = arith.constant 0 : index
    %c0_11 = arith.constant 0 : index
    %9 = vector.load %arg3[%c0_10, %c0_11] : memref<160x16xbf16, #tpu.memory_space<vmem>>, vector<160x16xbf16>
    %cst_12 = arith.constant dense<0.000000e+00> : vector<8x16xf32>
    %10 = tpu.matmul %8, %9, %cst_12 {dimension_numbers = #tpu.dot_dimension_numbers<[1], [0], [0], [1], [0, 0, 1, 1], [], []>} : vector<8x160xbf16>, vector<160x16xbf16>, vector<8x16xf32> -> vector<8x16xf32>
    %c0_13 = arith.constant 0 : index
    %c0_14 = arith.constant 0 : index
    %11 = vector.load %arg4[%c0_13, %c0_14] : memref<1x16xf32, #tpu.memory_space<vmem>>, vector<1x16xf32>
    %12 = vector.broadcast %11 : vector<1x16xf32> to vector<8x16xf32>
    %13 = arith.addf %10, %12 : vector<8x16xf32>
    %c0_15 = arith.constant 0 : index
    %c0_16 = arith.constant 0 : index
    %14 = vector.load %arg5[%c0_15, %c0_16] : memref<8x16xf32, #tpu.memory_space<vmem>>, vector<8x16xf32>
    tpu.vector_store %arg5[%c0_15, %c0_16], %13 {strides = array<i32>} : memref<8x16xf32, #tpu.memory_space<vmem>>, vector<8x16xf32>,
    return
  }
  func.func @transform_0(%arg0: i32) -> (i32, i32) {
    %c0_i32 = arith.constant 0 : i32
    %c0_i32_0 = arith.constant 0 : i32
    return %arg0, %c0_i32 : i32, i32
  }
  func.func @transform_1(%arg0: i32) -> (i32, i32) {
    %c0_i32 = arith.constant 0 : i32
    %c0_i32_0 = arith.constant 0 : i32
    return %arg0, %c0_i32 : i32, i32
  }
  func.func @transform_2(%arg0: i32) -> (i32, i32) {
    %c0_i32 = arith.constant 0 : i32
    %c0_i32_0 = arith.constant 0 : i32
    %c0_i32_1 = arith.constant 0 : i32
    return %c0_i32, %c0_i32_0 : i32, i32
  }
  func.func @transform_3(%arg0: i32) -> (i32, i32) {
    %c0_i32 = arith.constant 0 : i32
    %c0_i32_0 = arith.constant 0 : i32
    %c0_i32_1 = arith.constant 0 : i32
    return %c0_i32, %c0_i32_0 : i32, i32
  }
  func.func @transform_4(%arg0: i32) -> (i32, i32) {
    %c0_i32 = arith.constant 0 : i32
    %c0_i32_0 = arith.constant 0 : i32
    return %arg0, %c0_i32 : i32, i32
  }
}

</mosaic_0001>

<bundles_post_ra>
// kernel: meta_modality_hybrid.1
= control target key start
LH: loop header
LB: loop body
LE: loop exit
PB: predicated region body
PF: predicated region fallthrough
CT: control target
= control target key end

     0   :  { %v237_v1 = vmov 0   ;;  %vm19_vm0 = vcmask 1043456   ;;  %vm20_vm1 = vcmask 261124   ;;  %vm25_vm3 = vcmask 125952   ;;  %s315_s0 = inlined_call_operand.vmem [shape: f32[8,16], index: 0, kind: input, shape index: {}]   ;;  %s316_s1 = inlined_call_operand.vmem [shape: f32[8,32], index: 1, kind: input, shape index: {}]   ;;  %s317_s2 = inlined_call_operand.vmem [shape: bf16[160,16], index: 2, kind: input, shape index: {}]   ;;  %s318_s3 = inlined_call_operand.vmem [shape: f32[1,16], index: 3, kind: input, shape index: {}]   ;;  %s319_s4 = inlined_call_operand.hbm [shape: f32[8,16], index: 4, kind: output, shape index: {}]  }
   0x1   :  { %v201_v0 = vld [vmem:[%s317_s2] sm:$0xff]   ;;  %129 = vmatprep.subr.bf16.mxu0 %v237_v1  ;;  %v202_v2 = vld [vmem:[%s317_s2 + $0x8] sm:$0xff]   ;;  %v203_v3 = vld [vmem:[%s317_s2 + $0x10] sm:$0xff]   ;;  %vm29_vm4 = vcmask 257024  }
   0x2   :  { %130 = vmatpush1.bf16.msra.mxu0 %v201_v0  ;;  %v204_v4 = vld [vmem:[%s317_s2 + $0x18] sm:$0xff]   ;;  %vm21_vm2 = vmor %vm20_vm1, %vm19_vm0  ;;  %v23_v5 = vld [vmem:[%s315_s0] sm:$0xff] }
   0x3   :  { %131 = vmatprep.subr.bf16.mxu0 %v237_v1  ;;  %v27_v6 = vld [vmem:[%s316_s1] sm:$0xff]  ;;  %22 = vst.msk [vmem:[#allocation2] sm:$0xff] %vm21_vm2, %v237_v1  ;;  %v24_v7 = vpack.c.bf16 %v23_v5, %v23_v5 }
   0x4   :  { %v28_v8 = vpack.c.bf16 %v27_v6, %v27_v6 }
   0x6   :  { %132 = vmatpush1.bf16.msra.mxu0 %v202_v2 }
   0x7   :  { %133 = vmatprep.subr.bf16.mxu0 %v237_v1 }
   0xa   :  { %134 = vmatpush1.bf16.msra.mxu0 %v203_v3 }
   0xb   :  { %135 = vmatprep.subr.bf16.mxu0 %v237_v1 }
   0xc   :  { %9 = vsyncpa [#allocation4], 0  ;;  %26 = vst.msk [vmem:[#allocation2] sm:$0xf] %vm25_vm3, %v24_v7  ;;  %v205_v9 = vld [vmem:[%s317_s2 + $0x20] sm:$0xff]   ;;  %v206_v10 = vld [vmem:[%s317_s2 + $0x28] sm:$0xff]  }
   0xd   :  { %30 = vst.msk [vmem:[#allocation2 + $0x4] sm:$0xf] %vm29_vm4, %v28_v8  ;;  %vm125_vm5 = vcmask 261120   ;;  %v207_v13 = vld [vmem:[%s317_s2 + $0x30] sm:$0xff]   ;;  %v208_v14 = vld [vmem:[%s317_s2 + $0x38] sm:$0xff]   ;;  %v209_v15 = vld [vmem:[%s317_s2 + $0x40] sm:$0xff]  }
   0xe   :  { %136 = vmatpush1.bf16.msra.mxu0 %v204_v4  ;;  %v210_v16 = vld [vmem:[%s317_s2 + $0x48] sm:$0xff]   ;;  %v185_v18 = vld [vmem:[%s318_s3] ss:$0 sm:$0xff]  ;;  %s238_s13 = smov [#allocation3]   ;;  %vm169_vm6 = vcmask 130048  }
   0xf   :  { %137 = vmatprep.subr.bf16.mxu0 %v237_v1  ;;  %s177_s14 = sshll.u32 %s238_s13, 4  ;;  %s178_s14 = int_to_ptr.vmem [resolvable:$true] %s177_s14 }
  0x10   :  { %s213_s15 = scalar_lea.vmem %s178_s14, 128  ;;  %p218_p1 = scmp.lt.s32.totalorder %s178_s14, %s178_s14 }
  0x11   :  { %p214_p0 = scmp.ne.s32.totalorder %s178_s14, %s213_s15  ;;  %p219_p2 = scmp.lt.s32.totalorder %s213_s15, %s213_s15 }
  0x12   :  { %138 = vmatpush1.bf16.msra.mxu0 %v205_v9 }
  0x13   :  { %139 = vmatprep.subr.bf16.mxu0 %v237_v1  ;;  %p220_p3 = por %p219_p2, %p218_p1 }
  0x14   :  { %v31_v11 = vld [vmem:[#allocation2] sm:$0xff] }
  0x15   :  { %v187_v12 = vcombine.high %v31_v11, %v31_v11  ;;  %v186_v17 = vcombine.low %v31_v11, %v31_v11  ;;  %p221_p4 = pnand %p220_p3, %p214_p0 }
  0x16   :  { %140 = vmatpush1.bf16.msra.mxu0 %v206_v10 }
  0x17   :  { %141 = vmatprep.subr.bf16.mxu0 %v237_v1  ;;  %198 = vmatprep.mubr.msk.bf16.mxu0 %vm125_vm5, %v187_v12 }
  0x1a   :  { %142 = vmatpush1.bf16.msra.mxu0 %v207_v13 }
  0x1b   :  { %143 = vmatprep.subr.bf16.mxu0 %v237_v1 }
  0x1e   :  { %144 = vmatpush1.bf16.msra.mxu0 %v208_v14 }
  0x1f   :  { %145 = vmatprep.subr.bf16.mxu0 %v237_v1 }
  0x22   :  { %146 = vmatpush1.bf16.msra.mxu0 %v209_v15 }
  0x23   :  { %147 = vmatprep.subr.bf16.mxu0 %v237_v1 }
  0x26   :  { %148 = vmatpush1.bf16.msra.mxu0 %v210_v16 }
  0x29   :  { %162 = vmatmul.mubr.bf16.vlgmr.msra.gmra.mrb[0].mxu0 %v186_v17 }
  0xfc   :  { %v163_v19 = vpop.f32.mrb[0].mxu0 }
  0xfd   :  { %v164_v20 = vadd.f32 %v185_v18, %v163_v19  ;;  %v165_v21 = vpop.f32.mrb[1].mxu0 }
  0xfe   :  { %v166_v22 = vpop.f32.mrb[2].mxu0 }
  0xff   :  { %v167_v23 = vpop.f32.mrb[3].mxu0  ;;  %170 = vst.msk [vmem:[#allocation3] sm:$0xff] %vm169_vm6, %v164_v20 }
 0x100   :  { %224 = shalt.err (!%p221_p4)
}
 0x101   :  { %s225_s3 = scalar_lea.hbm %s319_s4, 128 }
 0x102   :  { %p226_p5 = scmp.ne.s32.totalorder %s319_s4, %s225_s3  ;;  %p229_p6 = scmp.lt.u32.totalorder %s225_s3, %s319_s4 }
 0x104   :  { %p231_p7 = pnand %p229_p6, %p226_p5 }
 0x106   :  { %234 = shalt.err (!%p231_p7)
}
 0x107   :  { %180 = dma.vmem_to_hbm [thread:$0]  %s178_s14, 128, %s319_s4, [#allocation4]  }
 0x108   :  { %235 = dma.done.wait [#allocation4], 128  }
 0x109   :  { %236 = vsyncadd [#allocation4], 4294967168 }
 0x10a   :  { %184 = vsyncpa [#allocation4], 1 }

</bundles_post_ra>
